<compile_context>
chip_gen: v7x
topology: tpu7x:2x2x1
jax: 0.10.0
libtpu: 0.0.40
codegen_flags: <defaults>
</compile_context>

<pallas_src>
import functools

import jax
import jax.numpy as jnp
import numpy as np
from jax.experimental import pallas as pl
from jax.experimental.pallas import tpu as pltpu


def _pick_policy_tile(pol_dim, cap=4096):
    """Largest multiple of 128 that divides pol_dim and is <= cap (else full dim)."""
    best = None
    t = 128
    while t <= min(pol_dim, cap):
        if pol_dim % t == 0:
            best = t
        t += 128
    return best if best is not None else pol_dim


def _alpha_loss_kernel(yv_ref, v_ref, yp_ref, pol_ref, out_ref, acc_ref,
                       *, inv_batch):
    j = pl.program_id(0)

    @pl.when(j == 0)
    def _():
        acc_ref[...] = jnp.zeros_like(acc_ref)

    # Partial policy cross-entropy for this lane tile: (B, TP) -> (B, 1).
    yp = yp_ref[...].astype(jnp.float32)
    tgt = pol_ref[...].astype(jnp.float32)
    pe = -tgt * jnp.log(yp + jnp.float32(1e-6))          # VPU mul + EUP log
    acc_ref[...] += jnp.sum(pe, axis=-1, keepdims=True)  # lane reduction

    @pl.when(j == pl.num_programs(0) - 1)
    def _():
        yv = yv_ref[...].astype(jnp.float32)
        v = v_ref[...].astype(jnp.float32)
        value_err = (v - yv) * (v - yv)                   # (B, 1)
        total = value_err + acc_ref[...]                  # (B, 1)
        out_ref[...] = (jnp.sum(total, axis=0, keepdims=True)
                        * jnp.float32(inv_batch))         # (1, 1) = mean


def alpha_loss(y_value, value, y_policy, policy):
    """Pallas forward of AlphaLoss; returns a scalar float32 loss."""
    B, P = y_policy.shape
    yv2 = y_value.reshape(B, 1).astype(jnp.float32)
    v2 = value.reshape(B, 1).astype(jnp.float32)
    yp = y_policy.astype(jnp.float32)
    pol = policy.astype(jnp.float32)

    tp = _pick_policy_tile(P)
    n_steps = P // tp

    kernel = functools.partial(_alpha_loss_kernel, inv_batch=1.0 / B)

    out = pl.pallas_call(
        kernel,
        out_shape=jax.ShapeDtypeStruct((1, 1), jnp.float32),
        grid_spec=pltpu.PrefetchScalarGridSpec(
            num_scalar_prefetch=0,
            grid=(n_steps,),
            in_specs=[
                pl.BlockSpec((B, 1), lambda j: (0, 0)),    # y_value (resident)
                pl.BlockSpec((B, 1), lambda j: (0, 0)),    # value   (resident)
                pl.BlockSpec((B, tp), lambda j: (0, j)),   # y_policy tile
                pl.BlockSpec((B, tp), lambda j: (0, j)),   # policy tile
            ],
            out_specs=pl.BlockSpec((1, 1), lambda j: (0, 0)),
            scratch_shapes=[pltpu.VMEM((B, 1), jnp.float32)],
        ),
        compiler_params=pltpu.CompilerParams(
            dimension_semantics=("arbitrary",)),
    )(yv2, v2, yp, pol)

    return out.reshape(())


# ----------------------------------------------------------------------------
# Pure-JAX reference mirroring the PyTorch AlphaLoss.forward
# ----------------------------------------------------------------------------
def reference(y_value, value, y_policy, policy):
    value_error = (value - y_value) ** 2
    policy_error = jnp.sum(
        -policy * jnp.log(jnp.float32(1e-6) + y_policy.astype(jnp.float32)),
        axis=1)
    return jnp.mean(value_error.reshape(-1).astype(jnp.float32) + policy_error)


if __name__ == "__main__":
    B, P = 8, 4864   # batch of 8, AlphaZero-style 4864-way policy head

    key = jax.random.PRNGKey(0)
    k1, k2, k3, k4 = jax.random.split(key, 4)
    y_policy = jax.nn.softmax(jax.random.normal(k1, (B, P), jnp.float32), axis=-1)
    policy = jax.nn.softmax(0.5 * jax.random.normal(k2, (B, P), jnp.float32), axis=-1)
    y_value = jnp.tanh(jax.random.normal(k3, (B, 1), jnp.float32))
    value = jnp.tanh(jax.random.normal(k4, (B, 1), jnp.float32))

    loss = alpha_loss(y_value, value, y_policy, policy)
    jax.block_until_ready(loss)

    ref = reference(y_value, value, y_policy, policy)
    np.testing.assert_allclose(np.asarray(loss), np.asarray(ref),
                               rtol=1e-4, atol=1e-4)
    assert loss.shape == ()
    print("KERNEL_OK")
</pallas_src>

<mosaic_0001>
module attributes {stable_mosaic.version = 11 : i64} {
  func.func @_alpha_loss_kernel(%arg0: i32, %arg1: memref<8x1xf32, #tpu.memory_space<vmem>>, %arg2: memref<8x1xf32, #tpu.memory_space<vmem>>, %arg3: memref<8x2432xf32, #tpu.memory_space<vmem>>, %arg4: memref<8x2432xf32, #tpu.memory_space<vmem>>, %arg5: memref<1x1xf32, #tpu.memory_space<vmem>>, %arg6: memref<8x1xf32, #tpu.memory_space<vmem>>) attributes {dimension_semantics = [#tpu.dimension_semantics<arbitrary>], iteration_bounds = array<i64: 2>, scalar_prefetch = 0 : i64, scratch_operands = 1 : i64, tpu.core_type = #tpu.core_type<tc>, window_params = [{pipeline_mode = #tpu.pipeline_mode<synchronous>, transform_indices = @transform_0, window_bounds = array<i64: 8, 1>}, {pipeline_mode = #tpu.pipeline_mode<synchronous>, transform_indices = @transform_1, window_bounds = array<i64: 8, 1>}, {transform_indices = @transform_2, window_bounds = array<i64: 8, 2432>}, {transform_indices = @transform_3, window_bounds = array<i64: 8, 2432>}, {pipeline_mode = #tpu.pipeline_mode<synchronous>, transform_indices = @transform_4, window_bounds = array<i64: 1, 1>}]} {
    %c0_i32 = arith.constant 0 : i32
    %0 = arith.cmpi eq, %arg0, %c0_i32 : i32
    %1 = arith.extui %0 : i1 to i32
    %c0_i32_0 = arith.constant 0 : i32
    %2 = arith.cmpi ne, %1, %c0_i32_0 : i32
    scf.if %2 {
      %cst_11 = arith.constant 0.000000e+00 : f32
      %19 = vector.broadcast %cst_11 : f32 to vector<8x1xf32>
      %c0_12 = arith.constant 0 : index
      %c0_13 = arith.constant 0 : index
      %20 = vector.load %arg6[%c0_12, %c0_13] : memref<8x1xf32, #tpu.memory_space<vmem>>, vector<8x1xf32>
      tpu.vector_store %arg6[%c0_12, %c0_13], %19 {strides = array<i32>} : memref<8x1xf32, #tpu.memory_space<vmem>>, vector<8x1xf32>,
    } else {
    }
    %c0 = arith.constant 0 : index
    %c0_1 = arith.constant 0 : index
    %3 = vector.load %arg3[%c0, %c0_1] : memref<8x2432xf32, #tpu.memory_space<vmem>>, vector<8x2432xf32>
    %c0_2 = arith.constant 0 : index
    %c0_3 = arith.constant 0 : index
    %4 = vector.load %arg4[%c0_2, %c0_3] : memref<8x2432xf32, #tpu.memory_space<vmem>>, vector<8x2432xf32>
    %cst = arith.constant 0.000000e+00 : f32
    %5 = vector.broadcast %cst : f32 to vector<8x2432xf32>
    %6 = arith.subf %5, %4 : vector<8x2432xf32>
    %cst_4 = arith.constant 9.99999997E-7 : f32
    %7 = vector.broadcast %cst_4 : f32 to vector<8x2432xf32>
    %8 = arith.addf %3, %7 : vector<8x2432xf32>
    %9 = math.log %8 : vector<8x2432xf32>
    %10 = arith.mulf %6, %9 : vector<8x2432xf32>
    %c0_5 = arith.constant 0 : index
    %c0_6 = arith.constant 0 : index
    %11 = vector.load %arg6[%c0_5, %c0_6] : memref<8x1xf32, #tpu.memory_space<vmem>>, vector<8x1xf32>
    %cst_7 = arith.constant dense<0.000000e+00> : vector<8xf32>
    %12 = vector.multi_reduction <add>, %10, %cst_7 [1] : vector<8x2432xf32> to vector<8xf32>
    %13 = vector.shape_cast %12 : vector<8xf32> to vector<8x1xf32>
    %14 = arith.addf %11, %13 : vector<8x1xf32>
    %c0_8 = arith.constant 0 : index
    %c0_9 = arith.constant 0 : index
    %15 = vector.load %arg6[%c0_8, %c0_9] : memref<8x1xf32, #tpu.memory_space<vmem>>, vector<8x1xf32>
    tpu.vector_store %arg6[%c0_8, %c0_9], %14 {strides = array<i32>} : memref<8x1xf32, #tpu.memory_space<vmem>>, vector<8x1xf32>,
    %c1_i32 = arith.constant 1 : i32
    %16 = arith.cmpi eq, %arg0, %c1_i32 : i32
    %17 = arith.extui %16 : i1 to i32
    %c0_i32_10 = arith.constant 0 : i32
    %18 = arith.cmpi ne, %17, %c0_i32_10 : i32
    scf.if %18 {
      %c0_11 = arith.constant 0 : index
      %c0_12 = arith.constant 0 : index
      %19 = vector.load %arg1[%c0_11, %c0_12] : memref<8x1xf32, #tpu.memory_space<vmem>>, vector<8x1xf32>
      %c0_13 = arith.constant 0 : index
      %c0_14 = arith.constant 0 : index
      %20 = vector.load %arg2[%c0_13, %c0_14] : memref<8x1xf32, #tpu.memory_space<vmem>>, vector<8x1xf32>
      %21 = arith.subf %20, %19 : vector<8x1xf32>
      %22 = arith.subf %20, %19 : vector<8x1xf32>
      %23 = arith.mulf %21, %22 : vector<8x1xf32>
      %c0_15 = arith.constant 0 : index
      %c0_16 = arith.constant 0 : index
      %24 = vector.load %arg6[%c0_15, %c0_16] : memref<8x1xf32, #tpu.memory_space<vmem>>, vector<8x1xf32>
      %25 = arith.addf %23, %24 : vector<8x1xf32>
      %cst_17 = arith.constant dense<0.000000e+00> : vector<1xf32>
      %26 = vector.multi_reduction <add>, %25, %cst_17 [0] : vector<8x1xf32> to vector<1xf32>
      %27 = vector.shape_cast %26 : vector<1xf32> to vector<1x1xf32>
      %cst_18 = arith.constant 1.250000e-01 : f32
      %28 = vector.broadcast %cst_18 : f32 to vector<1x1xf32>
      %29 = arith.mulf %27, %28 : vector<1x1xf32>
      %c0_19 = arith.constant 0 : index
      %c0_20 = arith.constant 0 : index
      %30 = vector.load %arg5[%c0_19, %c0_20] : memref<1x1xf32, #tpu.memory_space<vmem>>, vector<1x1xf32>
      tpu.vector_store %arg5[%c0_19, %c0_20], %29 {strides = array<i32>} : memref<1x1xf32, #tpu.memory_space<vmem>>, vector<1x1xf32>,
    } else {
    }
    return
  }
  func.func @transform_0(%arg0: i32) -> (i32, i32) {
    %c0_i32 = arith.constant 0 : i32
    %c0_i32_0 = arith.constant 0 : i32
    %c0_i32_1 = arith.constant 0 : i32
    return %c0_i32, %c0_i32_0 : i32, i32
  }
  func.func @transform_1(%arg0: i32) -> (i32, i32) {
    %c0_i32 = arith.constant 0 : i32
    %c0_i32_0 = arith.constant 0 : i32
    %c0_i32_1 = arith.constant 0 : i32
    return %c0_i32, %c0_i32_0 : i32, i32
  }
  func.func @transform_2(%arg0: i32) -> (i32, i32) {
    %c0_i32 = arith.constant 0 : i32
    %c0_i32_0 = arith.constant 0 : i32
    return %c0_i32, %arg0 : i32, i32
  }
  func.func @transform_3(%arg0: i32) -> (i32, i32) {
    %c0_i32 = arith.constant 0 : i32
    %c0_i32_0 = arith.constant 0 : i32
    return %c0_i32, %arg0 : i32, i32
  }
  func.func @transform_4(%arg0: i32) -> (i32, i32) {
    %c0_i32 = arith.constant 0 : i32
    %c0_i32_0 = arith.constant 0 : i32
    %c0_i32_1 = arith.constant 0 : i32
    return %c0_i32, %c0_i32_0 : i32, i32
  }
}

</mosaic_0001>

<bundles_post_ra>
// kernel: tpu_custom_call.1
= control target key start
LH: loop header
LB: loop body
LE: loop exit
PB: predicated region body
PF: predicated region fallthrough
CT: control target
= control target key end

     0   :  { %9 = vsyncpa [#allocation4], 0  ;;  %s991_s0 = inlined_call_operand.vmem [shape: f32[8,1], index: 0, kind: input, shape index: {}]   ;;  %s992_s1 = inlined_call_operand.vmem [shape: f32[8,1], index: 1, kind: input, shape index: {}]   ;;  %s993_s2 = inlined_call_operand.hbm [shape: f32[8,4864], index: 2, kind: input, shape index: {}]   ;;  %s994_s3 = inlined_call_operand.hbm [shape: f32[8,4864], index: 3, kind: input, shape index: {}]   ;;  %s995_s4 = inlined_call_operand.hbm [shape: f32[1,1], index: 4, kind: output, shape index: {}]  }
   0x1   :  { %11 = vsyncpa [#allocation4 + $0x1], 0 }
   0x2   :  { %12 = vsyncpa [#allocation7], 0 }
   0x3   :  { %14 = vsyncpa [#allocation7 + $0x1], 0 }
   0x4   :  { %15 = vsyncpa [#allocation5], 0  ;;  %s771_s15 = smov 0   ;;  %s773_s16 = smov 0  }
   0x5   :  { %s775_s17 = smov 0   ;;  %s777_s18 = smov 0  }
   0x6 LB: > { %s790_s19 = sadd.s32 4294967295, %s740_s18   ;;  %s793_s20 = sadd.s32 1, %s740_s18   ;;  %s740_s18 = sphi %s777_s18, %s1006_s18   ;;  %s736_s17 = sphi %s775_s17, %s1005_s17   ;;  %s732_s16 = sphi %s773_s16, %s1004_s16   ;;  %s728_s15 = sphi %s771_s15, %s1003_s15  }
   0x7   : > { %s67_s21 = ssub.s32 %s740_s18, %s793_s20  ;;  %s70_s22 = sadd.s32 1, %s736_s17 }
   0x8   : > { %p68_p0 = scmp.eq.s32.totalorder %s67_s21, 0  ;;  %p77_p1 = scmp.ne.s32.totalorder %s736_s17, %s732_s16 }
   0x9   : > { %p78_p2 = scmp.eq.s32.totalorder %s740_s18, 0  ;;  %p83_p3 = scmp.ne.s32.totalorder %s732_s16, %s728_s15 }
   0xa   : > { %s803_s23 = scalar_select %p68_p0, %s736_s17, %s70_s22  }
   0xb   : > { %p79_p4 = por %p78_p2, %p77_p1  ;;  %p84_p5 = scmp.eq.s32.totalorder %s790_s19, 0 }
   0xc   : > { %p537_p6 = scmp.lt.s32.totalorder %s740_s18, 2  ;;  %s812_s25 = sand.u32 1, %s736_s17  }
   0xd   : > { %p807_p7 = por %p84_p5, %p83_p3  ;;  %s519_s26 = smul.u32 152, %s812_s25 }
   0xe   : > { %s517_s27 = smul.u32 2432, %s740_s18  ;;  %p816_p8 = pnand %p537_p6, %p79_p4 }
   0xf   : > { %s997_s24 = scalar_select %p807_p7, 1, 0 }
  0x10   : > { %s826_s5 = scalar_lea.hbm %s993_s2, %s517_s27  ;;  %s164_s6 = scalar_lea.vmem [#allocation3], %s519_s26 }
  0x11   : > { %s172_s7 = sshll.u32 %s164_s6, 4  ;;  %s161_s8 = scalar_lea.sflag [#allocation4], %s812_s25  ;;  %s830_s7 = int_to_ptr.vmem [resolvable:$true] %s172_s7 }
  0x12   : > { %s612_s9 = scalar_lea.hbm %s826_s5, 2432  ;;  %p614_p11 = pneg %p816_p8 }
  0x13   : > { %p613_p10 = scmp.ne.s32.totalorder %s826_s5, %s612_s9  ;;  %s617_s12 = scalar_lea.hbm %s993_s2, 4864 }
  0x14   : > { %p618_p0 = scmp.lt.u32.totalorder %s826_s5, %s993_s2  ;;  %p619_p1 = scmp.lt.u32.totalorder %s617_s12, %s612_s9 }
  0x15   : > { %p615_p12 = pnand %p614_p11, %p613_p10  ;;  %p621_p3 = scmp.lt.u32.totalorder %s612_s9, %s826_s5 }
  0x16   : > { %p620_p2 = por %p619_p1, %p618_p0 }
  0x17   : > { %p616_p13 = pneg %p615_p12 }
  0x18   : > { %p622_p4 = por %p621_p3, %p620_p2 }
  0x1a   : > { %p623_p5 = pnand %p622_p4, %p616_p13 }
  0x1c   : > { %626 = shalt.err (!%p623_p5)
}
  0x1d   : > { %s627_s15 = scalar_lea.vmem %s830_s7, 2432  ;;  %s742_s21 = smov [#allocation3]  }
  0x1e   : > { %p628_p6 = scmp.ne.s32.totalorder %s830_s7, %s627_s15  ;;  %s632_s22 = sshll.u32 %s742_s21, 4  ;;  %s633_s22 = int_to_ptr.vmem [resolvable:$false] %s632_s22 }
  0x1f   : > { %s634_s29 = scalar_lea.vmem %s633_s22, 4864  ;;  %p635_p9 = scmp.lt.s32.totalorder %s830_s7, %s633_s22 }
  0x20   : > { %p630_p10 = pnand %p628_p6, %p614_p11  ;;  %p636_p0 = scmp.lt.s32.totalorder %s634_s29, %s627_s15 }
  0x22   : > { %p631_p12 = pneg %p630_p10  ;;  %p637_p1 = por %p636_p0, %p635_p9 }
  0x24   : > { %p638_p2 = pnand %p637_p1, %p631_p12 }
  0x26   : > { %641 = shalt.err (!%p638_p2)
}
  0x27   : > { %533 = dma.hbm_to_vmem [thread:$0]  (!%p816_p8), %s826_s5, 2432, %s830_s7, %s161_s8  }
  0x28   : > { %p196_p13 = scmp.lt.s32.totalorder %s740_s18, 3  ;;  %s864_s9 = scalar_lea.hbm %s994_s3, %s517_s27 }
  0x29   : > { %p999_p9 = scmp.ge.s32.totalorder %s740_s18, 1  ;;  %s183_s11 = scalar_lea.vmem [#allocation6], %s519_s26 }
  0x2a   : > { %s191_s12 = sshll.u32 %s183_s11, 4  ;;  %s180_s5 = scalar_lea.sflag [#allocation7], %s812_s25  ;;  %s192_s12 = int_to_ptr.vmem [resolvable:$true] %s191_s12 }
  0x2b   : > { %p868_p3 = pnand %p999_p9, %p196_p13  ;;  %s642_s7 = scalar_lea.hbm %s864_s9, 2432 }
  0x2c   : > { %p643_p4 = scmp.ne.s32.totalorder %s864_s9, %s642_s7  ;;  %s647_s8 = scalar_lea.hbm %s994_s3, 4864 }
  0x2d   : > { %s1000_s10 = scalar_select %p868_p3, 1, 0 }
  0x2e   : > { %p645_p5 = pnand %p643_p4, %p614_p11  ;;  %p648_p10 = scmp.lt.u32.totalorder %s864_s9, %s994_s3 }
  0x2f   : > { %p649_p12 = scmp.lt.u32.totalorder %s647_s8, %s642_s7  ;;  %p651_p1 = scmp.lt.u32.totalorder %s642_s7, %s864_s9 }
  0x30   : > { %p646_p6 = pneg %p645_p5 }
  0x31   : > { %p650_p0 = por %p649_p12, %p648_p10 }
  0x33   : > { %p652_p2 = por %p651_p1, %p650_p0 }
  0x35   : > { %p653_p13 = pnand %p652_p2, %p646_p6 }
  0x37   : > { %656 = shalt.err (!%p653_p13)
}
  0x38   : > { %s657_s25 = scalar_lea.vmem %s192_s12, 2432  ;;  %s743_s26 = smov [#allocation6]  }
  0x39   : > { %p658_p9 = scmp.ne.s32.totalorder %s192_s12, %s657_s25  ;;  %s662_s15 = sshll.u32 %s743_s26, 4  ;;  %s663_s15 = int_to_ptr.vmem [resolvable:$false] %s662_s15 }
  0x3a   : > { %s664_s21 = scalar_lea.vmem %s663_s15, 4864  ;;  %p665_p7 = scmp.lt.s32.totalorder %s192_s12, %s663_s15 }
  0x3b   : > { %p660_p4 = pnand %p658_p9, %p614_p11  ;;  %p666_p3 = scmp.lt.s32.totalorder %s664_s21, %s657_s25 }
  0x3d   : > { %p661_p5 = pneg %p660_p4  ;;  %p667_p10 = por %p666_p3, %p665_p7 }
  0x3f   : > { %p668_p12 = pnand %p667_p10, %p661_p5 }
  0x41   : > { %671 = shalt.err (!%p668_p12)
}
  0x42   : > { %536 = dma.hbm_to_vmem [thread:$0]  (!%p816_p8), %s864_s9, 2432, %s192_s12, %s180_s5  }
  0x43   : > { %p1001_p6 = scmp.ne.s32.totalorder %s1000_s10, 0 }
  0x44   : > { %s202_s22 = sand.u32 (!%p1001_p6), 1, %s732_s16   ;;  %p1002_p11 = scmp.ne.s32.totalorder (!%p1001_p6), %s997_s24, 0 }
  0x45   : > { %200 = sbr.rel (%p1001_p6) target bundleno = 338 (0x152), region = 36  ;;  %s203_s30 = scalar_lea.sflag (!%p1001_p6), [#allocation4], %s202_s22 }
  0x46   : > { %s521_s29 = smul.u32 (!%p1001_p6), 152, %s202_s22 }
  0x48   : > { %s897_s6 = scalar_lea.vmem (!%p1001_p6), [#allocation3], %s521_s29 }
  0x4c   : > { %715 = dma.done.wait (%p1002_p11), %s203_s30, 2432  }
  0x4d   : > { %717 = vsyncadd (%p1002_p11), %s203_s30, 4294964864  ;;  %s212_s11 = scalar_lea.sflag [#allocation7], %s202_s22  ;;  %s903_s28 = scalar_lea.vmem [#allocation6], %s521_s29 }
  0x4e   : > { %719 = dma.done.wait (%p1002_p11), %s212_s11, 2432  }
  0x4f   : > { %721 = vsyncadd (%p1002_p11), %s212_s11, 4294964864  ;;  %p511_p7 = scmp.ne.s32.totalorder %s790_s19, 0 }
  0x50   : > { %vm246_vm0 = vcmask (!%p511_p7), 7168   ;;  %v744_v0 = vmov (!%p511_p7), 0.0  }
  0x51   : > { %245 = sbr.rel (%p511_p7) target bundleno = 88 (0x58), region = 48  ;;  %247 = vst.msk [vmem:[#allocation2] sm:$0xff] (!%p511_p7), %vm246_vm0, %v744_v0 }
  0x58 PF: > { %v248_v1 = vld [vmem:[%s897_s6] sm:$0xff]  ;;  %v249_v2 = vld [vmem:[%s897_s6 + $0x8] sm:$0xff]  ;;  %v250_v3 = vld [vmem:[%s897_s6 + $0x10] sm:$0xff]  ;;  %vm403_vm1 = vcmask 7168   ;;  %p512_p8 = scmp.ne.s32.totalorder %s790_s19, 1 }
  0x59   : > { %v251_v4 = vld [vmem:[%s897_s6 + $0x18] sm:$0xff]  ;;  %v305_v5 = vadd.f32 1e-06, %v248_v1  ;;  %v252_v6 = vld [vmem:[%s897_s6 + $0x20] sm:$0xff]  ;;  %v306_v7 = vadd.f32 1e-06, %v249_v2 }
  0x5a   : > { %v253_v8 = vld [vmem:[%s897_s6 + $0x28] sm:$0xff]  ;;  %v307_v9 = vadd.f32 1e-06, %v250_v3  ;;  %v308_v10 = vadd.f32 1e-06, %v251_v4  ;;  %v254_v13 = vld [vmem:[%s897_s6 + $0x30] sm:$0xff] }
  0x5b   : > { %574 = vlog2.f32 %v305_v5  ;;  %v309_v11 = vadd.f32 1e-06, %v252_v6  ;;  %v310_v12 = vadd.f32 1e-06, %v253_v8  ;;  %v255_v14 = vld [vmem:[%s897_s6 + $0x38] sm:$0xff]  ;;  %v256_v15 = vld [vmem:[%s897_s6 + $0x40] sm:$0xff] }
  0x5c   : > { %576 = vlog2.f32 %v306_v7  ;;  %v257_v16 = vld [vmem:[%s897_s6 + $0x48] sm:$0xff]  ;;  %v258_v17 = vld [vmem:[%s897_s6 + $0x50] sm:$0xff]  ;;  %v268_v20 = vld [vmem:[%s903_s28 + $0x8] sm:$0xff]  ;;  %v311_v22 = vadd.f32 1e-06, %v254_v13  ;;  %vm423_vm2 = vcmask (!%p512_p8), 0  }
  0x5d   : > { %578 = vlog2.f32 %v307_v9  ;;  %v267_v18 = vld [vmem:[%s903_s28] sm:$0xff]  ;;  %v269_v21 = vld [vmem:[%s903_s28 + $0x10] sm:$0xff]  ;;  %v312_v23 = vadd.f32 1e-06, %v255_v14  ;;  %v259_v25 = vld [vmem:[%s897_s6 + $0x58] sm:$0xff]  ;;  %v287_v35 = vsub.f32 0.0, %v268_v20 }
  0x5e   : > { %580 = vlog2.f32 %v308_v10  ;;  %v270_v26 = vld [vmem:[%s903_s28 + $0x18] sm:$0xff]  ;;  %v313_v27 = vadd.f32 1e-06, %v256_v15  ;;  %v314_v28 = vadd.f32 1e-06, %v257_v16  ;;  %v286_v30 = vsub.f32 0.0, %v267_v18 }
  0x5f   : > { %582 = vlog2.f32 %v309_v11  ;;  %v315_v31 = vadd.f32 1e-06, %v258_v17  ;;  %v260_v33 = vld [vmem:[%s897_s6 + $0x60] sm:$0xff]  ;;  %v261_v34 = vld [vmem:[%s897_s6 + $0x68] sm:$0xff]  ;;  %v288_v36 = vsub.f32 0.0, %v269_v21  ;;  %v271_v38 = vld [vmem:[%s903_s28 + $0x20] sm:$0xff] }
  0x60   : > { %584 = vlog2.f32 %v310_v12  ;;  %v289_v39 = vsub.f32 0.0, %v270_v26  ;;  %v316_v40 = vadd.f32 1e-06, %v259_v25  ;;  %v272_v46 = vld [vmem:[%s903_s28 + $0x28] sm:$0xff]  ;;  %v317_v47 = vadd.f32 1e-06, %v260_v33 }
  0x61   : > { %586 = vlog2.f32 %v311_v22  ;;  %v262_v49 = vld [vmem:[%s897_s6 + $0x70] sm:$0xff]  ;;  %v290_v50 = vsub.f32 0.0, %v271_v38  ;;  %v273_v54 = vld [vmem:[%s903_s28 + $0x30] sm:$0xff]  ;;  %v318_v55 = vadd.f32 1e-06, %v261_v34  ;;  %v263_v56 = vld [vmem:[%s897_s6 + $0x78] sm:$0xff] }
  0x62   : > { %588 = vlog2.f32 %v312_v23  ;;  %v291_v57 = vsub.f32 0.0, %v272_v46  ;;  %v274_v61 = vld [vmem:[%s903_s28 + $0x38] sm:$0xff]  ;;  %v319_v62 = vadd.f32 1e-06, %v262_v49  ;;  %v264_v63 = vld [vmem:[%s897_s6 + $0x80] sm:$0xff]  ;;  %v292_v0 = vsub.f32 0.0, %v273_v54 }
  0x63   : > { %590 = vlog2.f32 %v313_v27  ;;  %v275_v4 = vld [vmem:[%s903_s28 + $0x40] sm:$0xff]  ;;  %v320_v5 = vadd.f32 1e-06, %v263_v56  ;;  %v265_v7 = vld [vmem:[%s897_s6 + $0x88] sm:$0xff]  ;;  %v293_v8 = vsub.f32 0.0, %v274_v61  ;;  %v276_v13 = vld [vmem:[%s903_s28 + $0x48] sm:$0xff] }
  0x64   : > { %592 = vlog2.f32 %v314_v28  ;;  %v321_v14 = vadd.f32 1e-06, %v264_v63  ;;  %v266_v17 = vld [vmem:[%s897_s6 + $0x90] sm:$0xff]  ;;  %v294_v18 = vsub.f32 0.0, %v275_v4  ;;  %v277_v23 = vld [vmem:[%s903_s28 + $0x50] sm:$0xff]  ;;  %v295_v25 = vsub.f32 0.0, %v276_v13 }
  0x65   : > { %v575_v19 = vpop.eup %574  ;;  %594 = vlog2.f32 %v315_v31  ;;  %v323_v31 = vadd.f32 1e-06, %v266_v17  ;;  %v281_v49 = vld [vmem:[%s903_s28 + $0x70] sm:$0xff]  ;;  %v283_v61 = vld [vmem:[%s903_s28 + $0x80] sm:$0xff] }
  0x66   : > { %v577_v24 = vpop.eup %576  ;;  %v325_v41 = vmul.f32 0.6931472, %v575_v19  ;;  %596 = vlog2.f32 %v316_v40  ;;  %v300_v56 = vsub.f32 0.0, %v281_v49  ;;  %v302_v4 = vsub.f32 0.0, %v283_v61 }
  0x67   : > { %v579_v29 = vpop.eup %578  ;;  %v327_v42 = vmul.f32 0.6931472, %v577_v24  ;;  %598 = vlog2.f32 %v317_v47  ;;  %v322_v24 = vadd.f32 1e-06, %v265_v7 }
  0x68   : > { %v581_v32 = vpop.eup %580  ;;  %v329_v43 = vmul.f32 0.6931472, %v579_v29  ;;  %v362_v48 = vmul.f32 %v325_v41, %v286_v30  ;;  %600 = vlog2.f32 %v318_v55  ;;  %v278_v30 = vld [vmem:[%s903_s28 + $0x58] sm:$0xff] }
  0x69   : > { %v583_v37 = vpop.eup %582  ;;  %v331_v44 = vmul.f32 0.6931472, %v581_v32  ;;  %v363_v52 = vmul.f32 %v327_v42, %v287_v35  ;;  %602 = vlog2.f32 %v319_v62  ;;  %v296_v32 = vsub.f32 0.0, %v277_v23  ;;  %v282_v55 = vld [vmem:[%s903_s28 + $0x78] sm:$0xff] }
  0x6a   : > { %v585_v45 = vpop.eup %584  ;;  %v333_v51 = vmul.f32 0.6931472, %v583_v37  ;;  %v364_v53 = vmul.f32 %v329_v43, %v288_v36  ;;  %604 = vlog2.f32 %v320_v5  ;;  %v279_v37 = vld [vmem:[%s903_s28 + $0x60] sm:$0xff]  ;;  %v297_v38 = vsub.f32 0.0, %v278_v30  ;;  %v280_v43 = vld [vmem:[%s903_s28 + $0x68] sm:$0xff] }
  0x6b   : > { %v335_v58 = vmul.f32 0.6931472, %v585_v45  ;;  %v365_v59 = vmul.f32 %v331_v44, %v289_v39  ;;  %v382_v60 = vadd.f32 %v363_v52, %v362_v48  ;;  %v587_v3 = vpop.eup %586  ;;  %606 = vlog2.f32 %v321_v14 }
  0x6c   : > { %v366_v1 = vmul.f32 %v333_v51, %v290_v50  ;;  %v589_v6 = vpop.eup %588  ;;  %v337_v9 = vmul.f32 0.6931472, %v587_v3  ;;  %608 = vlog2.f32 %v322_v24  ;;  %v298_v44 = vsub.f32 0.0, %v279_v37  ;;  %v284_v3 = vld [vmem:[%s903_s28 + $0x88] sm:$0xff] }
  0x6d   : > { %v383_v2 = vadd.f32 %v382_v60, %v364_v53  ;;  %v367_v10 = vmul.f32 %v335_v58, %v291_v57  ;;  %v591_v12 = vpop.eup %590  ;;  %v339_v15 = vmul.f32 0.6931472, %v589_v6  ;;  %610 = vlog2.f32 %v323_v31  ;;  %v381_v24 = vld [vmem:[#allocation2] sm:$0xff] }
  0x6e   : > { %v593_v16 = vpop.eup %592  ;;  %v341_v19 = vmul.f32 0.6931472, %v591_v12  ;;  %v368_v20 = vmul.f32 %v337_v9, %v292_v0  ;;  %v299_v50 = vsub.f32 0.0, %v280_v43  ;;  %v301_v62 = vsub.f32 0.0, %v282_v55  ;;  %v285_v9 = vld [vmem:[%s903_s28 + $0x90] sm:$0xff] }
  0x6f   : > { %v384_v11 = vadd.f32 %v383_v2, %v365_v59  ;;  %v595_v22 = vpop.eup %594  ;;  %v343_v26 = vmul.f32 0.6931472, %v593_v16  ;;  %v369_v27 = vmul.f32 %v339_v15, %v293_v8  ;;  %v304_v14 = vsub.f32 0.0, %v285_v9 }
  0x70   : > { %v597_v29 = vpop.eup %596  ;;  %v345_v33 = vmul.f32 0.6931472, %v595_v22  ;;  %v370_v34 = vmul.f32 %v341_v19, %v294_v18 }
  0x71   : > { %v385_v21 = vadd.f32 %v384_v11, %v366_v1  ;;  %v599_v36 = vpop.eup %598  ;;  %v347_v39 = vmul.f32 0.6931472, %v597_v29  ;;  %v371_v40 = vmul.f32 %v343_v26, %v295_v25 }
  0x72   : > { %v601_v42 = vpop.eup %600  ;;  %v349_v45 = vmul.f32 0.6931472, %v599_v36  ;;  %v372_v46 = vmul.f32 %v345_v33, %v296_v32 }
  0x73   : > { %v386_v28 = vadd.f32 %v385_v21, %v367_v10  ;;  %v603_v48 = vpop.eup %602  ;;  %v351_v51 = vmul.f32 0.6931472, %v601_v42  ;;  %v373_v52 = vmul.f32 %v347_v39, %v297_v38  ;;  %v303_v10 = vsub.f32 0.0, %v284_v3 }
  0x74   : > { %v605_v54 = vpop.eup %604  ;;  %v353_v57 = vmul.f32 0.6931472, %v603_v48  ;;  %v374_v58 = vmul.f32 %v349_v45, %v298_v44 }
  0x75   : > { %v387_v35 = vadd.f32 %v386_v28, %v368_v20  ;;  %v607_v60 = vpop.eup %606  ;;  %v355_v63 = vmul.f32 0.6931472, %v605_v54  ;;  %v375_v0 = vmul.f32 %v351_v51, %v299_v50  ;;  %v410_v28 = vld [vmem:[%s992_s1] sm:$0xff] (!%p512_p8) }
  0x76   : > { %v609_v2 = vpop.eup %608  ;;  %v357_v5 = vmul.f32 0.6931472, %v607_v60  ;;  %v376_v6 = vmul.f32 %v353_v57, %v300_v56 }
  0x77   : > { %v388_v41 = vadd.f32 %v387_v35, %v369_v27  ;;  %v611_v8 = vpop.eup %610  ;;  %v359_v11 = vmul.f32 0.6931472, %v609_v2  ;;  %v377_v12 = vmul.f32 %v355_v63, %v301_v62  ;;  %v409_v27 = vld [vmem:[%s991_s0] sm:$0xff] (!%p512_p8) }
  0x78   : > { %v361_v15 = vmul.f32 0.6931472, %v611_v8  ;;  %v378_v16 = vmul.f32 %v357_v5, %v302_v4  ;;  %v411_v29 = vsub.f32 (!%p512_p8), %v410_v28, %v409_v27 }
  0x79   : > { %v389_v47 = vadd.f32 %v388_v41, %v370_v34  ;;  %v379_v18 = vmul.f32 %v359_v11, %v303_v10 }
  0x7a   : > { %v380_v20 = vmul.f32 %v361_v15, %v304_v14  ;;  %v412_v31 = vmul.f32 (!%p512_p8), %v411_v29, %v411_v29 }
  0x7b   : > { %v390_v53 = vadd.f32 %v389_v47, %v371_v40 }
  0x7d   : > { %v391_v59 = vadd.f32 %v390_v53, %v372_v46 }
  0x7f   : > { %v392_v1 = vadd.f32 %v391_v59, %v373_v52 }
  0x81   : > { %v393_v7 = vadd.f32 %v392_v1, %v374_v58 }
  0x83   : > { %v394_v13 = vadd.f32 %v393_v7, %v375_v0 }
  0x85   : > { %v395_v17 = vadd.f32 %v394_v13, %v376_v6 }
  0x87   : > { %v396_v19 = vadd.f32 %v395_v17, %v377_v12 }
  0x89   : > { %v397_v21 = vadd.f32 %v396_v19, %v378_v16 }
  0x8b   : > { %v398_v22 = vadd.f32 %v397_v21, %v379_v18 }
  0x8d   : > { %v399_v23 = vadd.f32 %v398_v22, %v380_v20 }
  0x8f   : > { %400 = vadd.xlane.f32.xlu0 %v399_v23 }
 0x119   : > { %408 = sbr.rel (%p512_p8) target bundleno = 313 (0x139), region = 52 }
 0x11c   : > { %v401_v25 = vpop.xlane.xlu0 %400 }
 0x11d   : > { %v402_v26 = vadd.f32 %v401_v25, %v381_v24 }
 0x11f   : > { %404 = vst.msk [vmem:[#allocation2] sm:$0xff] %vm403_vm1, %v402_v26 }
 0x126   : > { %v413_v30 = vld [vmem:[#allocation2] sm:$0xff] }
 0x127   : > { %v414_v32 = vadd.f32 %v413_v30, %v412_v31 }
 0x129   : > { %v415_v33 = vsel %vm403_vm1, %v414_v32, 0.0 }
 0x12a   : > { %v416_v34 = vrot.slane %v415_v33, 4 }
 0x12c   : > { %v417_v35 = vadd.f32 %v416_v34, %v415_v33 }
 0x12e   : > { %v418_v36 = vrot.slane %v417_v35, 2 }
 0x130   : > { %v419_v37 = vadd.f32 %v418_v36, %v417_v35 }
 0x132   : > { %v420_v38 = vrot.slane %v419_v37, 1 }
 0x134   : > { %v421_v39 = vadd.f32 %v420_v38, %v419_v37 }
 0x136   : > { %v422_v40 = vmul.f32 0.125, %v421_v39 }
 0x138   : > { %424 = vst.msk [vmem:[#allocation8] sm:$0x1] %vm423_vm2, %v422_v40 }
 0x139 PF: > { %p538_p3 = scmp.eq.s32.totalorder %s790_s19, 1  ;;  %s745_s5 = smov [#allocation8]  }
 0x13a   : > { %s432_s7 = sshll.u32 %s745_s5, 4  ;;  %s433_s7 = int_to_ptr.vmem [resolvable:$true] %s432_s7 }
 0x13b   : > { %s672_s18 = scalar_lea.vmem %s433_s7, 16  ;;  %s678_s27 = scalar_lea.vmem %s433_s7, 32 }
 0x13c   : > { %p673_p0 = scmp.ne.s32.totalorder %s433_s7, %s672_s18  ;;  %p679_p13 = scmp.lt.s32.totalorder %s433_s7, %s433_s7 }
 0x13d   : > { %p680_p9 = scmp.lt.s32.totalorder %s678_s27, %s672_s18 }
 0x13e   : > { %p674_p1 = pnand %p673_p0, %p538_p3 }
 0x13f   : > { %p681_p4 = por %p680_p9, %p679_p13 }
 0x140   : > { %p675_p2 = pneg %p674_p1 }
 0x142   : > { %p682_p5 = pnand %p681_p4, %p675_p2 }
 0x144   : > { %685 = shalt.err (!%p682_p5)
}
 0x145   : > { %s686_s14 = scalar_lea.hbm %s995_s4, 16 }
 0x146   : > { %p687_p10 = scmp.ne.s32.totalorder %s995_s4, %s686_s14  ;;  %p692_p11 = scmp.lt.u32.totalorder %s686_s14, %s995_s4 }
 0x148   : > { %p688_p12 = pnand %p687_p10, %p538_p3 }
 0x14a   : > { %p689_p6 = pneg %p688_p12 }
 0x14c   : > { %p694_p7 = pnand %p692_p11, %p689_p6 }
 0x14e   : > { %697 = shalt.err (!%p694_p7)
}
 0x14f   : > { %527 = dma.vmem_to_hbm [thread:$0]  (%p538_p3), %s433_s7, 16, %s995_s4, [#allocation5]  }
 0x150   : > { %723 = dma.done.wait (%p538_p3), [#allocation5], 16  }
 0x151   : > { %725 = vsyncadd (%p538_p3), [#allocation5], 4294967280 }
 0x152 PF: > { %p18_p8 = scmp.ge.s32.totalorder %s793_s20, 4   ;;  %s1003_s15 = smov %s732_s16 }
 0x153   : > { %s1004_s16 = smov %s736_s17  ;;  %s1005_s17 = smov %s803_s23 }
 0x154   : > { %s1006_s18 = smov %s793_s20  ;;  %20 = sbr.rel (!%p18_p8) target bundleno = 6 (0x6), region = 94 }
 0x15b   :  { %445 = vsyncpa [#allocation4], 1 }
 0x15c   :  { %447 = vsyncpa [#allocation4 + $0x1], 1 }
 0x15d   :  { %448 = vsyncpa [#allocation7], 1 }
 0x15e   :  { %450 = vsyncpa [#allocation7 + $0x1], 1 }
 0x15f   :  { %451 = vsyncpa [#allocation5], 1 }
 0x160   :  { %453 = vsyncpa [#allocation5 + $0x1], 1 }

</bundles_post_ra>
